<compile_context>
chip_gen: v7x
topology: tpu7x:2x2x1
jax: 0.10.0
libtpu: 0.0.40
codegen_flags: <defaults>
</compile_context>

<pallas_src>
import jax
import jax.numpy as jnp
from jax.experimental import pallas as pl
from jax.experimental.pallas import tpu as pltpu

IN = 784
IN_PAD = 896          # 7 * 128
H1 = 128
H2 = 64
H2_PAD = 128
OUT = 10
OUT_PAD = 128
NEG_BIG = -1e30       # finite "−inf" for padded logit lanes (avoids inf-inf NaNs)

DEFAULT_TILE_B = 512  # 2 x (512*896 bf16) input buffers + weights << 32 MiB scoped VMEM (v7x-safe)


def _round_up(n, m):
    return ((n + m - 1) // m) * m


def mlp_kernel(x_ref, w1_ref, b1_ref, w2_ref, b2_ref, w3_ref, b3_ref, o_ref):
    x = x_ref[...]                                                   # (tb, 896) bf16

    # fc1 + relu (bf16 matmul, f32 accumulate, f32 elementwise)
    h1 = jnp.dot(x, w1_ref[...], preferred_element_type=jnp.float32)
    h1 = jnp.maximum(h1 + b1_ref[...], 0.0)                          # (tb, 128) f32

    # fc2 + relu (padded to 128 output lanes; padded lanes are exactly 0)
    h2 = jnp.dot(h1.astype(jnp.bfloat16), w2_ref[...],
                 preferred_element_type=jnp.float32)
    h2 = jnp.maximum(h2 + b2_ref[...], 0.0)                          # (tb, 128) f32

    # fc3 + softmax over 128 lanes (padded lanes carry -1e30 bias -> prob 0)
    logits = jnp.dot(h2.astype(jnp.bfloat16), w3_ref[...],
                     preferred_element_type=jnp.float32)
    logits = logits + b3_ref[...]                                    # (tb, 128) f32
    m = jnp.max(logits, axis=1, keepdims=True)
    e = jnp.exp(logits - m)
    denom = jnp.sum(e, axis=1, keepdims=True)
    o_ref[...] = e * pl.reciprocal(denom, approx=True)


def prepare_params(w1, b1, w2, b2, w3, b3):
    """Pad to lane-dense shapes and cast weights to bf16 (done once, outside kernel).

    Inputs are the PyTorch-equivalent f32 params with (in, out) weight layout:
      w1:(784,128) b1:(1,128)  w2:(128,64) b2:(1,64)  w3:(64,10) b3:(1,10)
    """
    w1p = jnp.zeros((IN_PAD, H1), jnp.float32).at[:IN, :].set(w1).astype(jnp.bfloat16)
    b1p = b1.reshape(1, H1).astype(jnp.float32)

    w2p = jnp.zeros((H1, H2_PAD), jnp.float32).at[:, :H2].set(w2).astype(jnp.bfloat16)
    b2p = jnp.zeros((1, H2_PAD), jnp.float32).at[:, :H2].set(b2.reshape(1, H2))

    w3p = jnp.zeros((H2_PAD, OUT_PAD), jnp.float32).at[:H2, :OUT].set(w3).astype(jnp.bfloat16)
    b3p = jnp.full((1, OUT_PAD), NEG_BIG, jnp.float32).at[:, :OUT].set(b3.reshape(1, OUT))

    return w1p, b1p, w2p, b2p, w3p, b3p


def network_forward(x, prepared_params, *, tile_b=DEFAULT_TILE_B):
    """x: (B, 784) f32. Returns (B, 10) f32 softmax probabilities."""
    B = x.shape[0]
    tb = min(tile_b, _round_up(B, 8))
    Bp = _round_up(B, tb)

    # Pad batch + feature dims, cast the matmul input to bf16 (layout plumbing
    # stays in the wrapper; the kernel only sees lane-dense slabs).
    xp = jnp.zeros((Bp, IN_PAD), jnp.bfloat16)
    xp = xp.at[:B, :IN].set(x.astype(jnp.bfloat16))

    w1p, b1p, w2p, b2p, w3p, b3p = prepared_params

    flops = 2 * Bp * (IN_PAD * H1 + H1 * H2_PAD + H2_PAD * OUT_PAD)
    bytes_accessed = (
        Bp * IN_PAD * 2                       # x (bf16)
        + (IN_PAD * H1 + H1 * H2_PAD + H2_PAD * OUT_PAD) * 2   # weights (bf16)
        + 3 * OUT_PAD * 4                     # biases (f32, approx)
        + Bp * OUT_PAD * 4                    # output (f32)
    )

    out_padded = pl.pallas_call(
        mlp_kernel,
        out_shape=jax.ShapeDtypeStruct((Bp, OUT_PAD), jnp.float32),
        grid=(pl.cdiv(Bp, tb),),
        in_specs=[
            pl.BlockSpec((tb, IN_PAD), lambda i: (i, 0)),        # x: tiled over batch
            pl.BlockSpec((IN_PAD, H1), lambda i: (0, 0)),        # w1: VMEM-resident
            pl.BlockSpec((1, H1), lambda i: (0, 0)),             # b1
            pl.BlockSpec((H1, H2_PAD), lambda i: (0, 0)),        # w2
            pl.BlockSpec((1, H2_PAD), lambda i: (0, 0)),         # b2
            pl.BlockSpec((H2_PAD, OUT_PAD), lambda i: (0, 0)),   # w3
            pl.BlockSpec((1, OUT_PAD), lambda i: (0, 0)),        # b3
        ],
        out_specs=pl.BlockSpec((tb, OUT_PAD), lambda i: (i, 0)),
        compiler_params=pltpu.CompilerParams(
            dimension_semantics=("parallel",),
        ),
        cost_estimate=pl.CostEstimate(
            flops=flops,
            transcendentals=Bp * OUT_PAD,
            bytes_accessed=bytes_accessed,
        ),
    )(xp, w1p, b1p, w2p, b2p, w3p, b3p)

    return out_padded[:B, :OUT]


def init_params(key):
    """Deterministic parameter init (PyTorch-Linear-like uniform ranges), f32."""
    ks = jax.random.split(key, 6)

    def linear(kw, kb, fan_in, fan_out):
        bound = 1.0 / jnp.sqrt(fan_in)
        # stored as (in, out) so the kernel can do x @ W directly
        w = jax.random.uniform(kw, (fan_in, fan_out), jnp.float32, -bound, bound)
        b = jax.random.uniform(kb, (1, fan_out), jnp.float32, -bound, bound)
        return w, b

    w1, b1 = linear(ks[0], ks[1], IN, H1)
    w2, b2 = linear(ks[2], ks[3], H1, H2)
    w3, b3 = linear(ks[4], ks[5], H2, OUT)
    return w1, b1, w2, b2, w3, b3


def reference_forward(x, w1, b1, w2, b2, w3, b3):
    h1 = jax.nn.relu(x @ w1 + b1)
    h2 = jax.nn.relu(h1 @ w2 + b2)
    return jax.nn.softmax(h2 @ w3 + b3, axis=1)


if __name__ == "__main__":
    key = jax.random.PRNGKey(0)
    k_x, k_p = jax.random.split(key)

    batch = 8
    x = jax.random.normal(k_x, (batch, IN), dtype=jnp.float32)
    params = init_params(k_p)
    prepared = prepare_params(*params)

    out = network_forward(x, prepared)
    out = jax.block_until_ready(out)

    # sanity check vs. plain-JAX f32 reference (loose tolerance: bf16 matmul
    # inputs + approx reciprocal in the kernel)
    ref = reference_forward(x, *params)
    assert out.shape == (batch, OUT)
    assert jnp.allclose(out, ref, atol=1e-2, rtol=1e-2), \
        f"max abs diff {jnp.max(jnp.abs(out - ref))}"
    assert jnp.allclose(jnp.sum(out, axis=1), 1.0, atol=5e-3)

    print("KERNEL_OK")
</pallas_src>

<mosaic_0001>
module attributes {stable_mosaic.version = 11 : i64} {
  func.func @mlp_kernel(%arg0: i32, %arg1: memref<8x896xbf16, #tpu.memory_space<vmem>>, %arg2: memref<896x128xbf16, #tpu.memory_space<vmem>>, %arg3: memref<1x128xf32, #tpu.memory_space<vmem>>, %arg4: memref<128x128xbf16, #tpu.memory_space<vmem>>, %arg5: memref<1x128xf32, #tpu.memory_space<vmem>>, %arg6: memref<128x128xbf16, #tpu.memory_space<vmem>>, %arg7: memref<1x128xf32, #tpu.memory_space<vmem>>, %arg8: memref<8x128xf32, #tpu.memory_space<vmem>>) attributes {dimension_semantics = [#tpu.dimension_semantics<parallel>], iteration_bounds = array<i64: 1>, scalar_prefetch = 0 : i64, scratch_operands = 0 : i64, tpu.core_type = #tpu.core_type<tc>, window_params = [{transform_indices = @transform_0, window_bounds = array<i64: 8, 896>}, {pipeline_mode = #tpu.pipeline_mode<synchronous>, transform_indices = @transform_1, window_bounds = array<i64: 896, 128>}, {pipeline_mode = #tpu.pipeline_mode<synchronous>, transform_indices = @transform_2, window_bounds = array<i64: 1, 128>}, {pipeline_mode = #tpu.pipeline_mode<synchronous>, transform_indices = @transform_3, window_bounds = array<i64: 128, 128>}, {pipeline_mode = #tpu.pipeline_mode<synchronous>, transform_indices = @transform_4, window_bounds = array<i64: 1, 128>}, {pipeline_mode = #tpu.pipeline_mode<synchronous>, transform_indices = @transform_5, window_bounds = array<i64: 128, 128>}, {pipeline_mode = #tpu.pipeline_mode<synchronous>, transform_indices = @transform_6, window_bounds = array<i64: 1, 128>}, {transform_indices = @transform_7, window_bounds = array<i64: 8, 128>}]} {
    %c0 = arith.constant 0 : index
    %c0_0 = arith.constant 0 : index
    %0 = vector.load %arg1[%c0, %c0_0] : memref<8x896xbf16, #tpu.memory_space<vmem>>, vector<8x896xbf16>
    %c0_1 = arith.constant 0 : index
    %c0_2 = arith.constant 0 : index
    %1 = vector.load %arg2[%c0_1, %c0_2] : memref<896x128xbf16, #tpu.memory_space<vmem>>, vector<896x128xbf16>
    %cst = arith.constant dense<0.000000e+00> : vector<8x128xf32>
    %2 = tpu.matmul %0, %1, %cst {dimension_numbers = #tpu.dot_dimension_numbers<[1], [0], [0], [1], [0, 0, 1, 1], [], []>} : vector<8x896xbf16>, vector<896x128xbf16>, vector<8x128xf32> -> vector<8x128xf32>
    %c0_3 = arith.constant 0 : index
    %c0_4 = arith.constant 0 : index
    %3 = vector.load %arg3[%c0_3, %c0_4] : memref<1x128xf32, #tpu.memory_space<vmem>>, vector<1x128xf32>
    %4 = vector.broadcast %3 : vector<1x128xf32> to vector<8x128xf32>
    %5 = arith.addf %2, %4 : vector<8x128xf32>
    %cst_5 = arith.constant 0.000000e+00 : f32
    %6 = vector.broadcast %cst_5 : f32 to vector<8x128xf32>
    %7 = arith.maximumf %5, %6 : vector<8x128xf32>
    %8 = arith.truncf %7 : vector<8x128xf32> to vector<8x128xbf16>
    %c0_6 = arith.constant 0 : index
    %c0_7 = arith.constant 0 : index
    %9 = vector.load %arg4[%c0_6, %c0_7] : memref<128x128xbf16, #tpu.memory_space<vmem>>, vector<128x128xbf16>
    %cst_8 = arith.constant dense<0.000000e+00> : vector<8x128xf32>
    %10 = tpu.matmul %8, %9, %cst_8 {dimension_numbers = #tpu.dot_dimension_numbers<[1], [0], [0], [1], [0, 0, 1, 1], [], []>} : vector<8x128xbf16>, vector<128x128xbf16>, vector<8x128xf32> -> vector<8x128xf32>
    %c0_9 = arith.constant 0 : index
    %c0_10 = arith.constant 0 : index
    %11 = vector.load %arg5[%c0_9, %c0_10] : memref<1x128xf32, #tpu.memory_space<vmem>>, vector<1x128xf32>
    %12 = vector.broadcast %11 : vector<1x128xf32> to vector<8x128xf32>
    %13 = arith.addf %10, %12 : vector<8x128xf32>
    %cst_11 = arith.constant 0.000000e+00 : f32
    %14 = vector.broadcast %cst_11 : f32 to vector<8x128xf32>
    %15 = arith.maximumf %13, %14 : vector<8x128xf32>
    %16 = arith.truncf %15 : vector<8x128xf32> to vector<8x128xbf16>
    %c0_12 = arith.constant 0 : index
    %c0_13 = arith.constant 0 : index
    %17 = vector.load %arg6[%c0_12, %c0_13] : memref<128x128xbf16, #tpu.memory_space<vmem>>, vector<128x128xbf16>
    %cst_14 = arith.constant dense<0.000000e+00> : vector<8x128xf32>
    %18 = tpu.matmul %16, %17, %cst_14 {dimension_numbers = #tpu.dot_dimension_numbers<[1], [0], [0], [1], [0, 0, 1, 1], [], []>} : vector<8x128xbf16>, vector<128x128xbf16>, vector<8x128xf32> -> vector<8x128xf32>
    %c0_15 = arith.constant 0 : index
    %c0_16 = arith.constant 0 : index
    %19 = vector.load %arg7[%c0_15, %c0_16] : memref<1x128xf32, #tpu.memory_space<vmem>>, vector<1x128xf32>
    %20 = vector.broadcast %19 : vector<1x128xf32> to vector<8x128xf32>
    %21 = arith.addf %18, %20 : vector<8x128xf32>
    %cst_17 = arith.constant dense<0xFF800000> : vector<8xf32>
    %22 = vector.multi_reduction <maximumf>, %21, %cst_17 [1] : vector<8x128xf32> to vector<8xf32>
    %23 = vector.shape_cast %22 : vector<8xf32> to vector<8x1xf32>
    %24 = vector.broadcast %23 : vector<8x1xf32> to vector<8x128xf32>
    %25 = arith.subf %21, %24 : vector<8x128xf32>
    %26 = math.exp %25 : vector<8x128xf32>
    %cst_18 = arith.constant dense<0.000000e+00> : vector<8xf32>
    %27 = vector.multi_reduction <add>, %26, %cst_18 [1] : vector<8x128xf32> to vector<8xf32>
    %28 = vector.shape_cast %27 : vector<8xf32> to vector<8x1xf32>
    %29 = tpu.reciprocal %28 {approx = true} : vector<8x1xf32> -> vector<8x1xf32>
    %30 = vector.broadcast %29 : vector<8x1xf32> to vector<8x128xf32>
    %31 = arith.mulf %26, %30 : vector<8x128xf32>
    %c0_19 = arith.constant 0 : index
    %c0_20 = arith.constant 0 : index
    %32 = vector.load %arg8[%c0_19, %c0_20] : memref<8x128xf32, #tpu.memory_space<vmem>>, vector<8x128xf32>
    tpu.vector_store %arg8[%c0_19, %c0_20], %31 {strides = array<i32>} : memref<8x128xf32, #tpu.memory_space<vmem>>, vector<8x128xf32>,
    return
  }
  func.func @transform_0(%arg0: i32) -> (i32, i32) {
    %c0_i32 = arith.constant 0 : i32
    %c0_i32_0 = arith.constant 0 : i32
    return %arg0, %c0_i32 : i32, i32
  }
  func.func @transform_1(%arg0: i32) -> (i32, i32) {
    %c0_i32 = arith.constant 0 : i32
    %c0_i32_0 = arith.constant 0 : i32
    %c0_i32_1 = arith.constant 0 : i32
    return %c0_i32, %c0_i32_0 : i32, i32
  }
  func.func @transform_2(%arg0: i32) -> (i32, i32) {
    %c0_i32 = arith.constant 0 : i32
    %c0_i32_0 = arith.constant 0 : i32
    %c0_i32_1 = arith.constant 0 : i32
    return %c0_i32, %c0_i32_0 : i32, i32
  }
  func.func @transform_3(%arg0: i32) -> (i32, i32) {
    %c0_i32 = arith.constant 0 : i32
    %c0_i32_0 = arith.constant 0 : i32
    %c0_i32_1 = arith.constant 0 : i32
    return %c0_i32, %c0_i32_0 : i32, i32
  }
  func.func @transform_4(%arg0: i32) -> (i32, i32) {
    %c0_i32 = arith.constant 0 : i32
    %c0_i32_0 = arith.constant 0 : i32
    %c0_i32_1 = arith.constant 0 : i32
    return %c0_i32, %c0_i32_0 : i32, i32
  }
  func.func @transform_5(%arg0: i32) -> (i32, i32) {
    %c0_i32 = arith.constant 0 : i32
    %c0_i32_0 = arith.constant 0 : i32
    %c0_i32_1 = arith.constant 0 : i32
    return %c0_i32, %c0_i32_0 : i32, i32
  }
  func.func @transform_6(%arg0: i32) -> (i32, i32) {
    %c0_i32 = arith.constant 0 : i32
    %c0_i32_0 = arith.constant 0 : i32
    %c0_i32_1 = arith.constant 0 : i32
    return %c0_i32, %c0_i32_0 : i32, i32
  }
  func.func @transform_7(%arg0: i32) -> (i32, i32) {
    %c0_i32 = arith.constant 0 : i32
    %c0_i32_0 = arith.constant 0 : i32
    return %arg0, %c0_i32 : i32, i32
  }
}

</mosaic_0001>

<bundles_post_ra>
// kernel: tpu_custom_call.1
= control target key start
LH: loop header
LB: loop body
LE: loop exit
PB: predicated region body
PF: predicated region fallthrough
CT: control target
= control target key end

     0   :  { %12 = vsyncpa [#allocation3], 0  ;;  %s1580_s0 = inlined_call_operand.hbm [shape: bf16[8,896], index: 0, kind: input, shape index: {}]   ;;  %s1581_s1 = inlined_call_operand.hbm [shape: bf16[896,128], index: 1, kind: input, shape index: {}]   ;;  %s1582_s2 = inlined_call_operand.vmem [shape: f32[1,128], index: 2, kind: input, shape index: {}]   ;;  %s1583_s3 = inlined_call_operand.hbm [shape: bf16[128,128], index: 3, kind: input, shape index: {}]   ;;  %s1584_s4 = inlined_call_operand.vmem [shape: f32[1,128], index: 4, kind: input, shape index: {}]   ;;  %s1585_s5 = inlined_call_operand.hbm [shape: bf16[128,128], index: 5, kind: input, shape index: {}]   ;;  %s1586_s6 = inlined_call_operand.vmem [shape: f32[1,128], index: 6, kind: input, shape index: {}]   ;;  %s1587_s7 = inlined_call_operand.hbm [shape: f32[8,128], index: 7, kind: output, shape index: {}]  }
   0x1   :  { %13 = vsyncpa [#allocation6], 0 }
   0x2   :  { %14 = vsyncpa [#allocation9], 0 }
   0x3   :  { %15 = vsyncpa [#allocation4], 0  ;;  %s1423_s24 = smov [#allocation5]   ;;  %s1305_s28 = scalar_lea.hbm %s1581_s1, 7168 }
   0x4   :  { %s31_s25 = sshll.u32 %s1423_s24, 4  ;;  %p1306_p0 = scmp.ne.s32.totalorder %s1581_s1, %s1305_s28  ;;  %s32_s25 = int_to_ptr.vmem [resolvable:$true] %s31_s25 }
   0x5   :  { %p1309_p1 = scmp.lt.u32.totalorder %s1305_s28, %s1581_s1 }
   0x7   :  { %p1311_p2 = pnand %p1309_p1, %p1306_p0 }
   0x9   :  { %1314 = shalt.err (!%p1311_p2)
}
   0xa   :  { %s1315_s10 = scalar_lea.vmem %s32_s25, 7168  ;;  %p1320_p4 = scmp.lt.s32.totalorder %s32_s25, %s32_s25 }
   0xb   :  { %p1316_p3 = scmp.ne.s32.totalorder %s32_s25, %s1315_s10  ;;  %p1321_p5 = scmp.lt.s32.totalorder %s1315_s10, %s1315_s10 }
   0xd   :  { %p1322_p6 = por %p1321_p5, %p1320_p4 }
   0xf   :  { %p1323_p7 = pnand %p1322_p6, %p1316_p3 }
  0x11   :  { %1326 = shalt.err (!%p1323_p7)
}
  0x12   :  { %s1424_s11 = smov 64   ;;  %s1425_s12 = smov 4  }
  0x13   :  { %37 = dma.hbm_to_vmem [thread:$0]  %s1581_s1, 7168, %s32_s25, [#allocation6], %s1424_s11, %s1424_s11, %s1425_s12  }
  0x14   :  { %s1426_s15 = smov [#allocation2]   ;;  %s1427_s17 = smov [#allocation7]  }
  0x15   :  { %s22_s16 = sshll.u32 %s1426_s15, 4  ;;  %s45_s18 = sshll.u32 %s1427_s17, 4  ;;  %s23_s16 = int_to_ptr.vmem [resolvable:$true] %s22_s16  ;;  %s46_s18 = int_to_ptr.vmem [resolvable:$true] %s45_s18 }
  0x16   :  { %s1327_s21 = scalar_lea.hbm %s1580_s0, 448 }
  0x17   :  { %p1328_p8 = scmp.ne.s32.totalorder %s1580_s0, %s1327_s21  ;;  %p1331_p9 = scmp.lt.u32.totalorder %s1327_s21, %s1580_s0 }
  0x19   :  { %p1333_p10 = pnand %p1331_p9, %p1328_p8 }
  0x1b   :  { %1336 = shalt.err (!%p1333_p10)
}
  0x1c   :  { %s1337_s1 = scalar_lea.vmem %s23_s16, 448  ;;  %p1342_p12 = scmp.lt.s32.totalorder %s23_s16, %s23_s16 }
  0x1d   :  { %p1338_p11 = scmp.ne.s32.totalorder %s23_s16, %s1337_s1  ;;  %p1343_p13 = scmp.lt.s32.totalorder %s1337_s1, %s1337_s1 }
  0x1f   :  { %p1344_p0 = por %p1343_p13, %p1342_p12 }
  0x21   :  { %p1345_p1 = pnand %p1344_p0, %p1338_p11 }
  0x23   :  { %1348 = shalt.err (!%p1345_p1)
}
  0x24   :  { %25 = dma.hbm_to_vmem [thread:$0]  %s1580_s0, 448, %s23_s16, [#allocation3]  }
  0x25   :  { %s1349_s30 = scalar_lea.hbm %s1583_s3, 1024 }
  0x26   :  { %p1350_p2 = scmp.ne.s32.totalorder %s1583_s3, %s1349_s30  ;;  %p1353_p3 = scmp.lt.u32.totalorder %s1349_s30, %s1583_s3 }
  0x28   :  { %p1355_p4 = pnand %p1353_p3, %p1350_p2 }
  0x2a   :  { %1358 = shalt.err (!%p1355_p4)
}
  0x2b   :  { %s1359_s14 = scalar_lea.vmem %s46_s18, 1024  ;;  %p1364_p6 = scmp.lt.s32.totalorder %s46_s18, %s46_s18 }
  0x2c   :  { %p1360_p5 = scmp.ne.s32.totalorder %s46_s18, %s1359_s14  ;;  %p1365_p7 = scmp.lt.s32.totalorder %s1359_s14, %s1359_s14 }
  0x2e   :  { %p1366_p8 = por %p1365_p7, %p1364_p6 }
  0x30   :  { %p1367_p9 = pnand %p1366_p8, %p1360_p5 }
  0x32   :  { %1370 = shalt.err (!%p1367_p9)
}
  0x33   :  { %51 = dma.hbm_to_vmem [thread:$0]  %s1583_s3, 1024, %s46_s18, [#allocation6], %s1424_s11, %s1424_s11, %s1425_s12  }
  0x34   :  { %s1428_s16 = smov [#allocation8]   ;;  %s1371_s21 = scalar_lea.hbm %s1585_s5, 1024 }
  0x35   :  { %s59_s17 = sshll.u32 %s1428_s16, 4  ;;  %p1372_p10 = scmp.ne.s32.totalorder %s1585_s5, %s1371_s21  ;;  %s60_s17 = int_to_ptr.vmem [resolvable:$true] %s59_s17 }
  0x36   :  { %p1375_p11 = scmp.lt.u32.totalorder %s1371_s21, %s1585_s5 }
  0x38   :  { %p1377_p12 = pnand %p1375_p11, %p1372_p10 }
  0x3a   :  { %1380 = shalt.err (!%p1377_p12)
}
  0x3b   :  { %s1381_s1 = scalar_lea.vmem %s60_s17, 1024  ;;  %p1386_p0 = scmp.lt.s32.totalorder %s60_s17, %s60_s17 }
  0x3c   :  { %p1382_p13 = scmp.ne.s32.totalorder %s60_s17, %s1381_s1  ;;  %p1387_p1 = scmp.lt.s32.totalorder %s1381_s1, %s1381_s1 }
  0x3e   :  { %p1388_p2 = por %p1387_p1, %p1386_p0 }
  0x40   :  { %p1389_p3 = pnand %p1388_p2, %p1382_p13 }
  0x42   :  { %1392 = shalt.err (!%p1389_p3)
}
  0x43   :  { %65 = dma.hbm_to_vmem [thread:$0]  %s1585_s5, 1024, %s60_s17, [#allocation9], %s1424_s11, %s1424_s11, %s1425_s12  }
  0x44   :  { %1415 = dma.done.wait [#allocation3], 448  }
  0x45   :  { %1416 = vsyncadd [#allocation3], 4294966848 }
  0x46   :  { %1417 = dma.done.wait [#allocation6], 8192  }
  0x47   :  { %1418 = vsyncadd [#allocation6], 4294959104 }
  0x48   :  { %1419 = dma.done.wait [#allocation9], 1024  }
  0x49   :  { %1420 = vsyncadd [#allocation9], 4294966272  ;;  %v1222_v0 = vld [vmem:[#allocation5 + $0x40] sm:$0xff]   ;;  %v1226_v4 = vld [vmem:[#allocation5 + $0x48] sm:$0xff]   ;;  %v1429_v42 = vmov 0.0   ;;  %vm1430_vm0 = vmmov 0  }
  0x4a   :  { %v1223_v1 = vld [vmem:[#allocation5] sm:$0xff]   ;;  %1060 = vmatprep.subr.bf16.mxu0 %v1222_v0  ;;  %v1227_v5 = vld [vmem:[#allocation5 + $0x8] sm:$0xff]   ;;  %v1230_v8 = vld [vmem:[#allocation5 + $0x50] sm:$0xff]  }
  0x4b   :  { %v1224_v2 = vld [vmem:[#allocation5 + $0xc0] sm:$0xff]   ;;  %1061 = vmatpush3.bf16.msra.mxu0 %v1223_v1  ;;  %v1228_v6 = vld [vmem:[#allocation5 + $0xc8] sm:$0xff]   ;;  %v1231_v9 = vld [vmem:[#allocation5 + $0x10] sm:$0xff]  }
  0x4c   :  { %v1225_v3 = vld [vmem:[#allocation5 + $0x80] sm:$0xff]   ;;  %1082 = vmatprep.subr.bf16.mxu1 %v1224_v2  ;;  %1062 = vmatprep.subr.bf16.mxu0 %v1226_v4  ;;  %v1229_v7 = vld [vmem:[#allocation5 + $0x88] sm:$0xff]   ;;  %v1232_v10 = vld [vmem:[#allocation5 + $0xd0] sm:$0xff]  }
  0x4d   :  { %1083 = vmatpush3.bf16.msra.mxu1 %v1225_v3  ;;  %v1233_v11 = vld [vmem:[#allocation5 + $0x90] sm:$0xff]   ;;  %v1234_v12 = vld [vmem:[#allocation5 + $0x58] sm:$0xff]   ;;  %v1238_v16 = vld [vmem:[#allocation5 + $0x60] sm:$0xff]  }
  0x4e   :  { %1084 = vmatprep.subr.bf16.mxu1 %v1228_v6  ;;  %v1235_v13 = vld [vmem:[#allocation5 + $0x18] sm:$0xff]   ;;  %v1239_v17 = vld [vmem:[#allocation5 + $0x20] sm:$0xff]   ;;  %v1242_v20 = vld [vmem:[#allocation5 + $0x68] sm:$0xff]  }
  0x4f   :  { %1063 = vmatpush3.bf16.msra.mxu0 %v1227_v5  ;;  %v1236_v14 = vld [vmem:[#allocation5 + $0xd8] sm:$0xff]   ;;  %v1240_v18 = vld [vmem:[#allocation5 + $0xe0] sm:$0xff]   ;;  %v1243_v21 = vld [vmem:[#allocation5 + $0x28] sm:$0xff]  }
  0x50   :  { %1064 = vmatprep.subr.bf16.mxu0 %v1230_v8  ;;  %v1237_v15 = vld [vmem:[#allocation5 + $0x98] sm:$0xff]   ;;  %v1241_v19 = vld [vmem:[#allocation5 + $0xa0] sm:$0xff]   ;;  %v1244_v22 = vld [vmem:[#allocation5 + $0xe8] sm:$0xff]  }
  0x51   :  { %1085 = vmatpush3.bf16.msra.mxu1 %v1229_v7  ;;  %v1245_v23 = vld [vmem:[#allocation5 + $0xa8] sm:$0xff]   ;;  %v1246_v24 = vld [vmem:[#allocation5 + $0x70] sm:$0xff]   ;;  %v1250_v28 = vld [vmem:[#allocation5 + $0x78] sm:$0xff]  }
  0x52   :  { %1086 = vmatprep.subr.bf16.mxu1 %v1232_v10  ;;  %v1247_v25 = vld [vmem:[#allocation5 + $0x30] sm:$0xff]   ;;  %v1251_v29 = vld [vmem:[#allocation5 + $0x38] sm:$0xff]   ;;  %v81_v31 = vld [vmem:[#allocation2] sm:$0xff] }
  0x53   :  { %1065 = vmatpush3.bf16.msra.mxu0 %v1231_v9  ;;  %v1248_v26 = vld [vmem:[#allocation5 + $0xf0] sm:$0xff]   ;;  %v1252_v30 = vld [vmem:[#allocation5 + $0xf8] sm:$0xff]   ;;  %v979_v32 = vcombine.low %v81_v31, %v81_v31  ;;  %v980_v33 = vcombine.high %v81_v31, %v81_v31  ;;  %v1256_v35 = vld [vmem:[#allocation5 + $0x140] sm:$0xff]  }
  0x54   :  { %1066 = vmatprep.subr.bf16.mxu0 %v1234_v12  ;;  %v1249_v27 = vld [vmem:[#allocation5 + $0xb0] sm:$0xff]   ;;  %v1255_v34 = vld [vmem:[#allocation5 + $0xb8] sm:$0xff]   ;;  %v1259_v39 = vld [vmem:[#allocation5 + $0x100] sm:$0xff]  }
  0x55   :  { %1087 = vmatpush3.bf16.msra.mxu1 %v1233_v11  ;;  %v82_v36 = vld [vmem:[#allocation2 + $0x8] sm:$0xff]  ;;  %597 = vmatprep.mubr.bf16.mxu0 %v980_v33  ;;  %v1260_v40 = vld [vmem:[#allocation5 + $0x180] sm:$0xff]   ;;  %v1267_v48 = vld [vmem:[#allocation5 + $0x158] sm:$0xff]  }
  0x56   :  { %1088 = vmatprep.subr.bf16.mxu1 %v1236_v14  ;;  %v981_v37 = vcombine.low %v82_v36, %v82_v36  ;;  %v982_v38 = vcombine.high %v82_v36, %v82_v36  ;;  %v1261_v41 = vld [vmem:[#allocation5 + $0x148] sm:$0xff]   ;;  %v1264_v45 = vld [vmem:[#allocation5 + $0x150] sm:$0xff]   ;;  %v1268_v49 = vld [vmem:[#allocation5 + $0x118] sm:$0xff]  }
  0x57   :  { %1067 = vmatpush3.bf16.msra.mxu0 %v1235_v13  ;;  %v1262_v43 = vld [vmem:[#allocation5 + $0x108] sm:$0xff]   ;;  %v1265_v46 = vld [vmem:[#allocation5 + $0x110] sm:$0xff]   ;;  %v1270_v50 = vld [vmem:[#allocation5 + $0x160] sm:$0xff]  }
  0x58   :  { %1068 = vmatprep.subr.bf16.mxu0 %v1238_v16  ;;  %637 = vmatprep.mubr.bf16.mxu1 %v982_v38  ;;  %v1263_v44 = vld [vmem:[#allocation5 + $0x188] sm:$0xff]   ;;  %v1266_v47 = vld [vmem:[#allocation5 + $0x190] sm:$0xff]   ;;  %v1269_v51 = vld [vmem:[#allocation5 + $0x198] sm:$0xff]  }
  0x59   :  { %1089 = vmatpush3.bf16.msra.mxu1 %v1237_v15  ;;  %v1271_v52 = vld [vmem:[#allocation5 + $0x120] sm:$0xff]   ;;  %v1273_v53 = vld [vmem:[#allocation5 + $0x168] sm:$0xff]   ;;  %v1276_v56 = vld [vmem:[#allocation5 + $0x170] sm:$0xff]  }
  0x5a   :  { %1090 = vmatprep.subr.bf16.mxu1 %v1240_v18  ;;  %v1272_v54 = vld [vmem:[#allocation5 + $0x1a0] sm:$0xff]   ;;  %v1274_v55 = vld [vmem:[#allocation5 + $0x128] sm:$0xff]   ;;  %v1277_v58 = vld [vmem:[#allocation5 + $0x130] sm:$0xff]  }
  0x5b   :  { %1069 = vmatpush3.bf16.msra.mxu0 %v1239_v17  ;;  %v1275_v57 = vld [vmem:[#allocation5 + $0x1a8] sm:$0xff]   ;;  %v83_v59 = vld [vmem:[#allocation2 + $0x10] sm:$0xff]  ;;  %v1284_v2 = vld [vmem:[#allocation2 + $0x18] ss:$0 sps:$4 sm:$0xff]  }
  0x5c   :  { %1070 = vmatprep.subr.bf16.mxu0 %v1242_v20  ;;  %v1278_v60 = vld [vmem:[#allocation5 + $0x1b0] sm:$0xff]   ;;  %v984_v61 = vcombine.high %v83_v59, %v83_v59  ;;  %v1279_v62 = vld [vmem:[#allocation5 + $0x178] sm:$0xff]   ;;  %v983_v1 = vcombine.low %v83_v59, %v83_v59  ;;  %v1285_v3 = vld [vmem:[#allocation7] sm:$0xff]  }
  0x5d   :  { %1091 = vmatpush3.bf16.msra.mxu1 %v1241_v19  ;;  %v1280_v63 = vld [vmem:[#allocation5 + $0x138] sm:$0xff]   ;;  %v1286_v4 = vld [vmem:[#allocation7 + $0x8] sm:$0xff]   ;;  %v1287_v5 = vld [vmem:[#allocation7 + $0x10] sm:$0xff]  }
  0x5e   :  { %1092 = vmatprep.subr.bf16.mxu1 %v1244_v22  ;;  %v1283_v0 = vld [vmem:[#allocation5 + $0x1b8] sm:$0xff]   ;;  %v1289_v7 = vld [vmem:[#allocation7 + $0x20] sm:$0xff]   ;;  %v1290_v8 = vld [vmem:[#allocation7 + $0x28] sm:$0xff]  }
  0x5f   :  { %1071 = vmatpush3.bf16.msra.mxu0 %v1243_v21  ;;  %v1288_v6 = vld [vmem:[#allocation7 + $0x18] sm:$0xff]   ;;  %v1291_v9 = vld [vmem:[#allocation7 + $0x30] sm:$0xff]   ;;  %v1293_v11 = vld [vmem:[#allocation8] sm:$0xff]  }
  0x60   :  { %1072 = vmatprep.subr.bf16.mxu0 %v1246_v24  ;;  %v1292_v10 = vld [vmem:[#allocation7 + $0x38] sm:$0xff]   ;;  %v1294_v12 = vld [vmem:[#allocation8 + $0x8] sm:$0xff]   ;;  %v1295_v13 = vld [vmem:[#allocation8 + $0x10] sm:$0xff]  }
  0x61   :  { %1093 = vmatpush3.bf16.msra.mxu1 %v1245_v23  ;;  %v1296_v14 = vld [vmem:[#allocation8 + $0x18] sm:$0xff]   ;;  %v1297_v15 = vld [vmem:[#allocation8 + $0x20] sm:$0xff]   ;;  %v1298_v16 = vld [vmem:[#allocation8 + $0x28] sm:$0xff]  }
  0x62   :  { %1094 = vmatprep.subr.bf16.mxu1 %v1248_v26  ;;  %v978_v18 = vld [vmem:[%s1582_s2] ss:$0 sm:$0xff] }
  0x63   :  { %1073 = vmatpush3.bf16.msra.mxu0 %v1247_v25 }
  0x64   :  { %1074 = vmatprep.subr.bf16.mxu0 %v1250_v28 }
  0x65   :  { %1095 = vmatpush3.bf16.msra.mxu1 %v1249_v27 }
  0x66   :  { %1096 = vmatprep.subr.bf16.mxu1 %v1252_v30 }
  0x67   :  { %1075 = vmatpush3.bf16.msra.mxu0 %v1251_v29 }
  0x68   :  { %1104 = vmatprep.subr.bf16.mxu0 %v1256_v35 }
  0x69   :  { %1097 = vmatpush3.bf16.msra.mxu1 %v1255_v34 }
  0x6a   :  { %598 = vmatmul.mubr.bf16.vlgmr.msra.gmra.mrb[0].mxu0 %v979_v32  ;;  %1153 = vmatprep.subr.bf16.mxu1 %v1429_v42 }
  0x6b   :  { %1105 = vmatpush3.bf16.msra.mxu0 %v1259_v39  ;;  %677 = vmatprep.mubr.bf16.mxu0 %v984_v61 }
  0x6c   :  { %638 = vmatmul.mubr.bf16.vlgmr.msra.gmra.mrb[0].mxu1 %v981_v37  ;;  %1106 = vmatprep.subr.bf16.mxu0 %v1261_v41 }
  0x6d   :  { %1154 = vmatpush3.bf16.msra.mxu1 %v1260_v40  ;;  %1169 = vmatprep.mubr.msk.bf16.mxu1 %vm1430_vm0, %v1429_v42 }
  0x6e   :  { %1155 = vmatprep.subr.bf16.mxu1 %v1429_v42 }
  0x6f   :  { %1107 = vmatpush3.bf16.msra.mxu0 %v1262_v43 }
  0x70   :  { %1108 = vmatprep.subr.bf16.mxu0 %v1264_v45  ;;  %v1300_v45 = vld [vmem:[#allocation8 + $0x38] sm:$0xff]  }
  0x71   :  { %1156 = vmatpush3.bf16.msra.mxu1 %v1263_v44  ;;  %v1299_v44 = vld [vmem:[#allocation8 + $0x30] sm:$0xff]  }
  0x72   :  { %1157 = vmatprep.subr.bf16.mxu1 %v1429_v42 }
  0x73   :  { %1109 = vmatpush3.bf16.msra.mxu0 %v1265_v46  ;;  %v1042_v46 = vld [vmem:[%s1584_s4] ss:$0 sm:$0xff]  ;;  %s1431_s4 = smov [#allocation10]  }
  0x74   :  { %1110 = vmatprep.subr.bf16.mxu0 %v1267_v48  ;;  %s967_s28 = sshll.u32 %s1431_s4, 4  ;;  %s968_s28 = int_to_ptr.vmem [resolvable:$true] %s967_s28 }
  0x75   :  { %1158 = vmatpush3.bf16.msra.mxu1 %v1266_v47  ;;  %p1398_p5 = scmp.lt.s32.totalorder %s968_s28, %s968_s28 }
  0x76   :  { %1159 = vmatprep.subr.bf16.mxu1 %v1429_v42 }
  0x77   :  { %1111 = vmatpush3.bf16.msra.mxu0 %v1268_v49 }
  0x78   :  { %1112 = vmatprep.subr.bf16.mxu0 %v1270_v50 }
  0x79   :  { %1160 = vmatpush3.bf16.msra.mxu1 %v1269_v51 }
  0x7a   :  { %1161 = vmatprep.subr.bf16.mxu1 %v1429_v42 }
  0x7b   :  { %1113 = vmatpush3.bf16.msra.mxu0 %v1271_v52 }
  0x7c   :  { %1114 = vmatprep.subr.bf16.mxu0 %v1273_v53 }
  0x7d   :  { %1162 = vmatpush3.bf16.msra.mxu1 %v1272_v54  ;;  %v1051_v54 = vld [vmem:[%s1586_s6] ss:$0 sm:$0xff]  ;;  %s1393_s6 = scalar_lea.vmem %s968_s28, 128 }
  0x7e   :  { %1163 = vmatprep.subr.bf16.mxu1 %v1429_v42  ;;  %p1394_p4 = scmp.ne.s32.totalorder %s968_s28, %s1393_s6  ;;  %p1399_p6 = scmp.lt.s32.totalorder %s1393_s6, %s1393_s6 }
  0x7f   :  { %1115 = vmatpush3.bf16.msra.mxu0 %v1274_v55 }
  0x80   :  { %1116 = vmatprep.subr.bf16.mxu0 %v1276_v56  ;;  %p1400_p7 = por %p1399_p6, %p1398_p5 }
  0x81   :  { %1164 = vmatpush3.bf16.msra.mxu1 %v1275_v57 }
  0x82   :  { %1165 = vmatprep.subr.bf16.mxu1 %v1429_v42  ;;  %p1401_p8 = pnand %p1400_p7, %p1394_p4 }
  0x83   :  { %1117 = vmatpush3.bf16.msra.mxu0 %v1277_v58 }
  0x84   :  { %1118 = vmatprep.subr.bf16.mxu0 %v1279_v62 }
  0x85   :  { %1166 = vmatpush3.bf16.msra.mxu1 %v1278_v60 }
  0x86   :  { %1167 = vmatprep.subr.bf16.mxu1 %v1429_v42 }
  0x87   :  { %1119 = vmatpush3.bf16.msra.mxu0 %v1280_v63 }
  0x88   :  { %1173 = vmatprep.subr.bf16.mxu0 %v1429_v42 }
  0x89   :  { %1168 = vmatpush3.bf16.msra.mxu1 %v1283_v0 }
  0x8a   :  { %678 = vmatmul.mubr.bf16.vlgmr.msra.gmra.mrb[4].mxu0 %v983_v1  ;;  %1193 = vmatprep.subr.bf16.mxu1 %v1429_v42 }
  0x8b   :  { %1189 = vmatprep.mubr.msk.bf16.mxu0 %vm1430_vm0, %v1429_v42  ;;  %1174 = vmatpush3.bf16.msra.mxu0 %v1285_v3 }
  0x8c   :  { %1170 = vmatmul.mubr.bf16.vlgmr.msra.gmra.mrb[4].mxu1 %v1284_v2  ;;  %1175 = vmatprep.subr.bf16.mxu0 %v1429_v42 }
  0x8d   :  { %1209 = vmatprep.mubr.msk.bf16.mxu1 %vm1430_vm0, %v1429_v42  ;;  %1194 = vmatpush3.bf16.msra.mxu1 %v1293_v11 }
  0x8e   :  { %1195 = vmatprep.subr.bf16.mxu1 %v1429_v42 }
  0x8f   :  { %1176 = vmatpush3.bf16.msra.mxu0 %v1286_v4 }
  0x90   :  { %1177 = vmatprep.subr.bf16.mxu0 %v1429_v42 }
  0x91   :  { %1196 = vmatpush3.bf16.msra.mxu1 %v1294_v12 }
  0x92   :  { %1197 = vmatprep.subr.bf16.mxu1 %v1429_v42 }
  0x93   :  { %1178 = vmatpush3.bf16.msra.mxu0 %v1287_v5 }
  0x94   :  { %1179 = vmatprep.subr.bf16.mxu0 %v1429_v42 }
  0x95   :  { %1198 = vmatpush3.bf16.msra.mxu1 %v1295_v13 }
  0x96   :  { %1199 = vmatprep.subr.bf16.mxu1 %v1429_v42 }
  0x97   :  { %1180 = vmatpush3.bf16.msra.mxu0 %v1288_v6 }
  0x98   :  { %1181 = vmatprep.subr.bf16.mxu0 %v1429_v42 }
  0x99   :  { %1200 = vmatpush3.bf16.msra.mxu1 %v1296_v14 }
  0x9a   :  { %1201 = vmatprep.subr.bf16.mxu1 %v1429_v42 }
  0x9b   :  { %1182 = vmatpush3.bf16.msra.mxu0 %v1289_v7 }
  0x9c   :  { %1183 = vmatprep.subr.bf16.mxu0 %v1429_v42 }
  0x9d   :  { %1202 = vmatpush3.bf16.msra.mxu1 %v1297_v15 }
  0x9e   :  { %1203 = vmatprep.subr.bf16.mxu1 %v1429_v42 }
  0x9f   :  { %1184 = vmatpush3.bf16.msra.mxu0 %v1290_v8 }
  0xa0   :  { %1185 = vmatprep.subr.bf16.mxu0 %v1429_v42 }
  0xa1   :  { %1204 = vmatpush3.bf16.msra.mxu1 %v1298_v16 }
  0xa2   :  { %1205 = vmatprep.subr.bf16.mxu1 %v1429_v42 }
  0xa3   :  { %1186 = vmatpush3.bf16.msra.mxu0 %v1291_v9 }
  0xa4   :  { %1187 = vmatprep.subr.bf16.mxu0 %v1429_v42 }
  0xa5   :  { %1206 = vmatpush3.bf16.msra.mxu1 %v1299_v44 }
  0xa6   :  { %1207 = vmatprep.subr.bf16.mxu1 %v1429_v42 }
  0xa7   :  { %1188 = vmatpush3.bf16.msra.mxu0 %v1292_v10 }
  0xa9   :  { %1208 = vmatpush3.bf16.msra.mxu1 %v1300_v45 }
 0x13d   :  { %v1076_v17 = vpop.f32.mrb[0].mxu0 }
 0x13e   :  { %v1077_v19 = vpop.f32.mrb[1].mxu0 }
 0x13f   :  { %v1078_v20 = vadd.f32 %v1077_v19, %v1076_v17  ;;  %v1079_v21 = vpop.f32.mrb[2].mxu0  ;;  %v1098_v22 = vpop.f32.mrb[0].mxu1 }
 0x140   :  { %v1080_v23 = vpop.f32.mrb[3].mxu0  ;;  %v1099_v24 = vpop.f32.mrb[1].mxu1 }
 0x141   :  { %v600_v25 = vadd.f32 %v1078_v20, %v978_v18  ;;  %v1100_v26 = vadd.f32 %v1099_v24, %v1098_v22  ;;  %v1101_v27 = vpop.f32.mrb[2].mxu1 }
 0x142   :  { %v1102_v28 = vpop.f32.mrb[3].mxu1 }
 0x143   :  { %v640_v29 = vadd.f32 %v1100_v26, %v600_v25 }
 0x15d   :  { %v1120_v30 = vpop.f32.mrb[4].mxu0 }
 0x15e   :  { %v1121_v31 = vpop.f32.mrb[5].mxu0 }
 0x15f   :  { %v1122_v32 = vadd.f32 %v1121_v31, %v1120_v30  ;;  %v1123_v33 = vpop.f32.mrb[6].mxu0  ;;  %v719_v34 = vpop.f32.mrb[4].mxu1 }
 0x160   :  { %v1124_v35 = vpop.f32.mrb[7].mxu0  ;;  %v1171_v36 = vpop.f32.mrb[5].mxu1 }
 0x161   :  { %v680_v37 = vadd.f32 %v1122_v32, %v640_v29  ;;  %v722_v38 = vpop.f32.mrb[6].mxu1 }
 0x162   :  { %v1172_v39 = vpop.f32.mrb[7].mxu1 }
 0x163   :  { %v720_v40 = vadd.f32 %v719_v34, %v680_v37 }
 0x165   :  { %v725_v41 = vmax.f32 %v720_v40, 0.0 }
 0x167   :  { %v726_v43 = vpack.c.bf16 %v725_v41, %v725_v41 }
 0x169   :  { %1190 = vmatmul.mubr.bf16.vlgmr.msra.gmra.mrb[8].mxu0 %v726_v43 }
 0x23c   :  { %v832_v47 = vpop.f32.mrb[8].mxu0 }
 0x23d   :  { %v833_v48 = vadd.f32 %v1042_v46, %v832_v47  ;;  %v1191_v49 = vpop.f32.mrb[9].mxu0 }
 0x23e   :  { %v835_v50 = vpop.f32.mrb[10].mxu0 }
 0x23f   :  { %v838_v51 = vmax.f32 %v833_v48, 0.0  ;;  %v1192_v52 = vpop.f32.mrb[11].mxu0 }
 0x241   :  { %v839_v53 = vpack.c.bf16 %v838_v51, %v838_v51 }
 0x243   :  { %1210 = vmatmul.mubr.bf16.vlgmr.msra.gmra.mrb[8].mxu1 %v839_v53 }
 0x316   :  { %v945_v55 = vpop.f32.mrb[8].mxu1 }
 0x317   :  { %v946_v42 = vadd.f32 %v1051_v54, %v945_v55  ;;  %v1211_v56 = vpop.f32.mrb[9].mxu1 }
 0x318   :  { %v948_v57 = vpop.f32.mrb[10].mxu1 }
 0x319   :  { %951 = vmax.xlane.f32.xlu0 %v946_v42  ;;  %v1212_v58 = vpop.f32.mrb[11].mxu1 }
 0x3a6   :  { %v952_v59 = vpop.xlane.xlu0 %951 }
 0x3a7   :  { %v953_v60 = vsub.f32 %v946_v42, %v952_v59 }
 0x3a9   :  { %v954_v61 = vmul.f32 1.442695, %v953_v60 }
 0x3ab   :  { %1301 = vpow2.f32 %v954_v61 }
 0x3b5   :  { %v1302_v62 = vpop.eup %1301 }
 0x3b6   :  { %956 = vadd.xlane.f32.xlu0 %v1302_v62 }
 0x443   :  { %v957_v63 = vpop.xlane.xlu0 %956 }
 0x444   :  { %1303 = vrcp.f32 %v957_v63 }
 0x44e   :  { %v1304_v0 = vpop.eup %1303 }
 0x44f   :  { %v959_v1 = vmul.f32 %v1304_v0, %v1302_v62 }
 0x451   :  { %960 = vst [vmem:[#allocation10] sm:$0xff] %v959_v1 }
 0x452   :  { %1404 = shalt.err (!%p1401_p8)
}
 0x453   :  { %s1405_s8 = scalar_lea.hbm %s1587_s7, 128 }
 0x454   :  { %p1406_p9 = scmp.ne.s32.totalorder %s1587_s7, %s1405_s8  ;;  %p1409_p10 = scmp.lt.u32.totalorder %s1405_s8, %s1587_s7 }
 0x456   :  { %p1411_p11 = pnand %p1409_p10, %p1406_p9 }
 0x458   :  { %1414 = shalt.err (!%p1411_p11)
}
 0x459   :  { %970 = dma.vmem_to_hbm [thread:$0]  %s968_s28, 128, %s1587_s7, [#allocation4]  }
 0x45a   :  { %1421 = dma.done.wait [#allocation4], 128  }
 0x45b   :  { %1422 = vsyncadd [#allocation4], 4294967168 }
 0x45c   :  { %974 = vsyncpa [#allocation3], 1 }
 0x45d   :  { %975 = vsyncpa [#allocation6], 1 }
 0x45e   :  { %976 = vsyncpa [#allocation9], 1 }
 0x45f   :  { %977 = vsyncpa [#allocation4], 1 }

</bundles_post_ra>
